<compile_context>
chip_gen: v6e
topology: v6e:2x2x1
jax: 0.10.0
libtpu: 0.0.40
codegen_flags: <defaults>
</compile_context>

<pallas_src>
import jax
import jax.numpy as jnp
from jax.experimental import pallas as pl
from jax.experimental.pallas import tpu as pltpu

_MAX_TILE_R = 4096        # rows per tile: 6 inputs x 4096 x 128 x 4B = 12 MiB/step
_VMEM_LIMIT = 40 << 20    # explicit scoped-VMEM limit (safe on v5e/v6e/v7x)


def _round_up(x, m):
    return (x + m - 1) // m * m


def _sublane_granularity(dtype):
    # f32 -> 8, bf16/fp16 -> 16, int8/fp8 -> 32 (packed-sublane tile granularity)
    return max(8, 32 // jnp.dtype(dtype).itemsize)


def _tpu_plan():
    """Return (num_slices, dimension_semantics).

    Two-way leading split mapped to the two TensorCores only on v7x
    (plain "parallel" barely changes codegen; CORE_PARALLEL guarantees it).
    Single slice on 1-TC chips (v5e/v6e), which also minimizes the tail.
    """
    try:
        kind = jax.devices()[0].device_kind.lower()
    except Exception:
        kind = ""
    if "v7" in kind:
        return 2, (pltpu.CORE_PARALLEL, pltpu.ARBITRARY)
    return 1, ("parallel", "arbitrary")


_NUM_SLICES, _DIM_SEMANTICS = _tpu_plan()


def _make_kernel(tile_r, half_rows, num_tiles, need_mask):
    """Kernel closure over static tile geometry."""
    groups = tile_r // 8

    def _accumulate(refs, o_ref, i, apply_mask):
        # Combine the six tiles first (in-kernel f32 upcast; free VPU work,
        # fully hidden under the input DMAs), mask once, then fold to (8,128).
        total = refs[0][0].astype(jnp.float32)
        for r in refs[1:]:
            total = total + r[0].astype(jnp.float32)
        if apply_mask:
            # Sublane-only iota; lane broadcast happens inside the select.
            row = (jax.lax.broadcasted_iota(jnp.int32, (tile_r, 1), 0)
                   + i * tile_r)
            total = jnp.where(row < half_rows, total, 0.0)
        # (8,128)-tiling-respecting reshape -> pure vreg adds on the VPU.
        o_ref[0] += total.reshape(groups, 8, 128).sum(axis=0)

    def kernel(p1_ref, p2_ref, l1_ref, l2_ref, e1_ref, e2_ref, o_ref):
        i = pl.program_id(1)
        refs = (p1_ref, p2_ref, l1_ref, l2_ref, e1_ref, e2_ref)

        @pl.when(i == 0)
        def _init():
            o_ref[...] = jnp.zeros_like(o_ref)

        if not need_mask:
            _accumulate(refs, o_ref, i, False)
        elif num_tiles == 1:
            _accumulate(refs, o_ref, i, True)
        else:
            # Statically specialized paths: only the last tile pays for the mask.
            @pl.when(i == num_tiles - 1)
            def _last():
                _accumulate(refs, o_ref, i, True)

            @pl.when(i != num_tiles - 1)
            def _full():
                _accumulate(refs, o_ref, i, False)

    return kernel


@jax.jit
def loss2extra(prediction1, prediction2, label1, label2,
               extra_args1, extra_args2):
    arrs = (prediction1, prediction2, label1, label2, extra_args1, extra_args2)
    n = prediction1.size
    assert all(a.size == n for a in arrs), "inputs must have equal numel"

    denom = jnp.float32(6.0 * float(n))

    rows = n // 128
    gran = max(_sublane_granularity(a.dtype) for a in arrs)

    # Tiny inputs: not worth a kernel launch; XLA handles this fine.
    if rows < gran:
        total = sum(jnp.sum(a.astype(jnp.float32)) for a in arrs)
        return total / denom

    num_slices = _NUM_SLICES if rows % _NUM_SLICES == 0 else 1
    dim_sem = _DIM_SEMANTICS if num_slices > 1 else ("parallel", "arbitrary")

    half_rows = rows // num_slices
    main_elems = num_slices * half_rows * 128

    if main_elems < n:
        # Ragged tail (< 128 elements per input) summed in plain JAX.
        # TODO(synk): the prefix slice below may materialize an HBM copy of
        # each input; for multiple-of-128 sizes (the common case, incl. the
        # test) this branch is never taken and the reshape is metadata-only.
        flats = [a.reshape(-1) for a in arrs]
        tail_total = sum(jnp.sum(f[main_elems:].astype(jnp.float32))
                         for f in flats)
        mains = [f[:main_elems].reshape(num_slices, half_rows, 128)
                 for f in flats]
    else:
        tail_total = jnp.float32(0.0)
        # Pure metadata reshape: no wrapper-side HBM copies.
        mains = [a.reshape(num_slices, half_rows, 128) for a in arrs]

    tile_r = min(_MAX_TILE_R, _round_up(half_rows, gran))
    num_tiles = pl.cdiv(half_rows, tile_r)
    need_mask = (half_rows % tile_r) != 0

    kernel = _make_kernel(tile_r, half_rows, num_tiles, need_mask)

    in_spec = pl.BlockSpec((1, tile_r, 128), lambda c, i: (c, i, 0))
    partials = pl.pallas_call(
        kernel,
        out_shape=jax.ShapeDtypeStruct((num_slices, 8, 128), jnp.float32),
        grid_spec=pltpu.PrefetchScalarGridSpec(
            num_scalar_prefetch=0,
            grid=(num_slices, num_tiles),
            in_specs=[in_spec] * 6,
            out_specs=pl.BlockSpec((1, 8, 128), lambda c, i: (c, 0, 0)),
        ),
        compiler_params=pltpu.CompilerParams(
            dimension_semantics=dim_sem,
            vmem_limit_bytes=_VMEM_LIMIT),
    )(*mains)

    return (jnp.sum(partials) + tail_total) / denom


if __name__ == "__main__":
    key = jax.random.PRNGKey(0)
    k1, k2, k3, k4, k5, k6 = jax.random.split(key, 6)

    shape = (2, 4, 16, 16)  # NCHW, small test shape
    prediction1 = jax.random.normal(k1, shape, dtype=jnp.float32)
    prediction2 = jax.random.normal(k2, shape, dtype=jnp.float32)
    label1 = jax.random.normal(k3, shape, dtype=jnp.float32)
    label2 = jax.random.normal(k4, shape, dtype=jnp.float32)
    extra_args1 = jax.random.normal(k5, shape, dtype=jnp.float32)
    extra_args2 = jax.random.normal(k6, shape, dtype=jnp.float32)

    result = loss2extra(prediction1, prediction2, label1, label2,
                        extra_args1, extra_args2)
    jax.block_until_ready(result)

    # Reference check in plain JAX.
    ref = (jnp.sum(prediction1) + jnp.sum(prediction2) + jnp.sum(label1) +
           jnp.sum(label2) + jnp.sum(extra_args1) + jnp.sum(extra_args2)) / (
               6 * prediction1.size)
    assert jnp.allclose(result, ref, rtol=1e-5, atol=1e-5), (result, ref)

    print("KERNEL_OK")
</pallas_src>

<mosaic_0001>
module attributes {stable_mosaic.version = 11 : i64} {
  func.func @kernel(%arg0: i32, %arg1: i32, %arg2: memref<1x16x128xf32, #tpu.memory_space<vmem>>, %arg3: memref<1x16x128xf32, #tpu.memory_space<vmem>>, %arg4: memref<1x16x128xf32, #tpu.memory_space<vmem>>, %arg5: memref<1x16x128xf32, #tpu.memory_space<vmem>>, %arg6: memref<1x16x128xf32, #tpu.memory_space<vmem>>, %arg7: memref<1x16x128xf32, #tpu.memory_space<vmem>>, %arg8: memref<1x8x128xf32, #tpu.memory_space<vmem>>) attributes {dimension_semantics = [#tpu.dimension_semantics<parallel>, #tpu.dimension_semantics<arbitrary>], iteration_bounds = array<i64: 1, 1>, scalar_prefetch = 0 : i64, scratch_operands = 0 : i64, tpu.core_type = #tpu.core_type<tc>, window_params = [{transform_indices = @transform_0, window_bounds = array<i64: 1, 16, 128>}, {transform_indices = @transform_1, window_bounds = array<i64: 1, 16, 128>}, {transform_indices = @transform_2, window_bounds = array<i64: 1, 16, 128>}, {transform_indices = @transform_3, window_bounds = array<i64: 1, 16, 128>}, {transform_indices = @transform_4, window_bounds = array<i64: 1, 16, 128>}, {transform_indices = @transform_5, window_bounds = array<i64: 1, 16, 128>}, {transform_indices = @transform_6, window_bounds = array<i64: 1, 8, 128>}]} {
    %c0_i32 = arith.constant 0 : i32
    %0 = arith.cmpi eq, %arg1, %c0_i32 : i32
    %1 = arith.extui %0 : i1 to i32
    %c0_i32_0 = arith.constant 0 : i32
    %2 = arith.cmpi ne, %1, %c0_i32_0 : i32
    scf.if %2 {
      %cst_24 = arith.constant 0.000000e+00 : f32
      %28 = vector.broadcast %cst_24 : f32 to vector<1x8x128xf32>
      %c0_25 = arith.constant 0 : index
      %c0_26 = arith.constant 0 : index
      %c0_27 = arith.constant 0 : index
      %29 = vector.load %arg8[%c0_25, %c0_26, %c0_27] : memref<1x8x128xf32, #tpu.memory_space<vmem>>, vector<1x8x128xf32>
      tpu.vector_store %arg8[%c0_25, %c0_26, %c0_27], %28 {strides = array<i32>} : memref<1x8x128xf32, #tpu.memory_space<vmem>>, vector<1x8x128xf32>,
    } else {
    }
    %c0 = arith.constant 0 : index
    %c0_1 = arith.constant 0 : index
    %c0_2 = arith.constant 0 : index
    %3 = vector.load %arg2[%c0, %c0_1, %c0_2] : memref<1x16x128xf32, #tpu.memory_space<vmem>>, vector<1x16x128xf32>
    %4 = vector.shape_cast %3 : vector<1x16x128xf32> to vector<16x128xf32>
    %c0_3 = arith.constant 0 : index
    %c0_4 = arith.constant 0 : index
    %c0_5 = arith.constant 0 : index
    %5 = vector.load %arg3[%c0_3, %c0_4, %c0_5] : memref<1x16x128xf32, #tpu.memory_space<vmem>>, vector<1x16x128xf32>
    %6 = vector.shape_cast %5 : vector<1x16x128xf32> to vector<16x128xf32>
    %7 = arith.addf %4, %6 : vector<16x128xf32>
    %c0_6 = arith.constant 0 : index
    %c0_7 = arith.constant 0 : index
    %c0_8 = arith.constant 0 : index
    %8 = vector.load %arg4[%c0_6, %c0_7, %c0_8] : memref<1x16x128xf32, #tpu.memory_space<vmem>>, vector<1x16x128xf32>
    %9 = vector.shape_cast %8 : vector<1x16x128xf32> to vector<16x128xf32>
    %10 = arith.addf %7, %9 : vector<16x128xf32>
    %c0_9 = arith.constant 0 : index
    %c0_10 = arith.constant 0 : index
    %c0_11 = arith.constant 0 : index
    %11 = vector.load %arg5[%c0_9, %c0_10, %c0_11] : memref<1x16x128xf32, #tpu.memory_space<vmem>>, vector<1x16x128xf32>
    %12 = vector.shape_cast %11 : vector<1x16x128xf32> to vector<16x128xf32>
    %13 = arith.addf %10, %12 : vector<16x128xf32>
    %c0_12 = arith.constant 0 : index
    %c0_13 = arith.constant 0 : index
    %c0_14 = arith.constant 0 : index
    %14 = vector.load %arg6[%c0_12, %c0_13, %c0_14] : memref<1x16x128xf32, #tpu.memory_space<vmem>>, vector<1x16x128xf32>
    %15 = vector.shape_cast %14 : vector<1x16x128xf32> to vector<16x128xf32>
    %16 = arith.addf %13, %15 : vector<16x128xf32>
    %c0_15 = arith.constant 0 : index
    %c0_16 = arith.constant 0 : index
    %c0_17 = arith.constant 0 : index
    %17 = vector.load %arg7[%c0_15, %c0_16, %c0_17] : memref<1x16x128xf32, #tpu.memory_space<vmem>>, vector<1x16x128xf32>
    %18 = vector.shape_cast %17 : vector<1x16x128xf32> to vector<16x128xf32>
    %19 = arith.addf %16, %18 : vector<16x128xf32>
    %c0_18 = arith.constant 0 : index
    %c0_19 = arith.constant 0 : index
    %c0_20 = arith.constant 0 : index
    %20 = vector.load %arg8[%c0_18, %c0_19, %c0_20] : memref<1x8x128xf32, #tpu.memory_space<vmem>>, vector<1x8x128xf32>
    %21 = vector.shape_cast %20 : vector<1x8x128xf32> to vector<8x128xf32>
    %22 = vector.shape_cast %19 : vector<16x128xf32> to vector<2x8x128xf32>
    %cst = arith.constant dense<0.000000e+00> : vector<8x128xf32>
    %23 = vector.multi_reduction <add>, %22, %cst [0] : vector<2x8x128xf32> to vector<8x128xf32>
    %24 = arith.addf %21, %23 : vector<8x128xf32>
    %c0_21 = arith.constant 0 : index
    %c0_22 = arith.constant 0 : index
    %c0_23 = arith.constant 0 : index
    %25 = vector.load %arg8[%c0_21, %c0_22, %c0_23] : memref<1x8x128xf32, #tpu.memory_space<vmem>>, vector<1x8x128xf32>
    %26 = vector.shape_cast %25 : vector<1x8x128xf32> to vector<8x128xf32>
    %27 = vector.shape_cast %24 : vector<8x128xf32> to vector<1x8x128xf32>
    tpu.vector_store %arg8[%c0_21, %c0_22, %c0_23], %27 {strides = array<i32>} : memref<1x8x128xf32, #tpu.memory_space<vmem>>, vector<1x8x128xf32>,
    return
  }
  func.func @transform_0(%arg0: i32, %arg1: i32) -> (i32, i32, i32) {
    %c0_i32 = arith.constant 0 : i32
    %c0_i32_0 = arith.constant 0 : i32
    return %arg0, %arg1, %c0_i32 : i32, i32, i32
  }
  func.func @transform_1(%arg0: i32, %arg1: i32) -> (i32, i32, i32) {
    %c0_i32 = arith.constant 0 : i32
    %c0_i32_0 = arith.constant 0 : i32
    return %arg0, %arg1, %c0_i32 : i32, i32, i32
  }
  func.func @transform_2(%arg0: i32, %arg1: i32) -> (i32, i32, i32) {
    %c0_i32 = arith.constant 0 : i32
    %c0_i32_0 = arith.constant 0 : i32
    return %arg0, %arg1, %c0_i32 : i32, i32, i32
  }
  func.func @transform_3(%arg0: i32, %arg1: i32) -> (i32, i32, i32) {
    %c0_i32 = arith.constant 0 : i32
    %c0_i32_0 = arith.constant 0 : i32
    return %arg0, %arg1, %c0_i32 : i32, i32, i32
  }
  func.func @transform_4(%arg0: i32, %arg1: i32) -> (i32, i32, i32) {
    %c0_i32 = arith.constant 0 : i32
    %c0_i32_0 = arith.constant 0 : i32
    return %arg0, %arg1, %c0_i32 : i32, i32, i32
  }
  func.func @transform_5(%arg0: i32, %arg1: i32) -> (i32, i32, i32) {
    %c0_i32 = arith.constant 0 : i32
    %c0_i32_0 = arith.constant 0 : i32
    return %arg0, %arg1, %c0_i32 : i32, i32, i32
  }
  func.func @transform_6(%arg0: i32, %arg1: i32) -> (i32, i32, i32) {
    %c0_i32 = arith.constant 0 : i32
    %c0_i32_0 = arith.constant 0 : i32
    %c0_i32_1 = arith.constant 0 : i32
    return %arg0, %c0_i32, %c0_i32_0 : i32, i32, i32
  }
}

</mosaic_0001>

<bundles_post_ra>
// kernel: loss2extra.1
= control target key start
LH: loop header
LB: loop body
LE: loop exit
PB: predicated region body
PF: predicated region fallthrough
CT: control target
= control target key end

     0   :  { %s133_s0 = inlined_call_operand.vmem [shape: f32[1,16,128], index: 0, kind: input, shape index: {}]   ;;  %s134_s1 = inlined_call_operand.vmem [shape: f32[1,16,128], index: 1, kind: input, shape index: {}]   ;;  %s135_s2 = inlined_call_operand.vmem [shape: f32[1,16,128], index: 2, kind: input, shape index: {}]   ;;  %s136_s3 = inlined_call_operand.vmem [shape: f32[1,16,128], index: 3, kind: input, shape index: {}]   ;;  %s137_s4 = inlined_call_operand.vmem [shape: f32[1,16,128], index: 4, kind: input, shape index: {}]   ;;  %s138_s5 = inlined_call_operand.vmem [shape: f32[1,16,128], index: 5, kind: input, shape index: {}]   ;;  %s139_s6 = inlined_call_operand.vmem [shape: f32[1,8,128], index: 6, kind: output, shape index: {}]  }
   0x1   :  { %v28_v0 = vld [vmem:[%s133_s0] sm:$0xff]  ;;  %v29_v1 = vld [vmem:[%s133_s0 + $0x8] sm:$0xff] }
   0x2   :  { %v30_v2 = vld [vmem:[%s134_s1] sm:$0xff]  ;;  %v31_v3 = vld [vmem:[%s134_s1 + $0x8] sm:$0xff] }
   0x3   :  { %v32_v4 = vadd.f32 %v30_v2, %v28_v0  ;;  %v34_v5 = vld [vmem:[%s135_s2] sm:$0xff]  ;;  %v35_v6 = vld [vmem:[%s135_s2 + $0x8] sm:$0xff]  ;;  %v33_v7 = vadd.f32 %v31_v3, %v29_v1 }
   0x4   :  { %v38_v8 = vld [vmem:[%s136_s3] sm:$0xff]  ;;  %v39_v10 = vld [vmem:[%s136_s3 + $0x8] sm:$0xff] }
   0x5   :  { %v36_v9 = vadd.f32 %v34_v5, %v32_v4  ;;  %v37_v11 = vadd.f32 %v35_v6, %v33_v7  ;;  %v42_v12 = vld [vmem:[%s137_s4] sm:$0xff]  ;;  %v43_v14 = vld [vmem:[%s137_s4 + $0x8] sm:$0xff] }
   0x6   :  { %v46_v16 = vld [vmem:[%s138_s5] sm:$0xff]  ;;  %v47_v18 = vld [vmem:[%s138_s5 + $0x8] sm:$0xff] }
   0x7   :  { %v40_v13 = vadd.f32 %v38_v8, %v36_v9  ;;  %v41_v15 = vadd.f32 %v39_v10, %v37_v11 }
   0x9   :  { %v44_v17 = vadd.f32 %v42_v12, %v40_v13  ;;  %v45_v19 = vadd.f32 %v43_v14, %v41_v15 }
   0xb   :  { %v48_v20 = vadd.f32 %v46_v16, %v44_v17  ;;  %v49_v21 = vadd.f32 %v47_v18, %v45_v19 }
   0xd   :  { %v51_v22 = vadd.f32 %v49_v21, %v48_v20 }
   0xf   :  { %53 = vst [vmem:[%s139_s6] sm:$0xff] %v51_v22 }

</bundles_post_ra>
